<compile_context>
chip_gen: v6e
topology: v6e:2x2x1
jax: 0.10.0
libtpu: 0.0.40
codegen_flags: <defaults>
</compile_context>

<pallas_src>
import math

import jax
import jax.numpy as jnp
from jax.experimental import pallas as pl
from jax.experimental.pallas import tpu as pltpu

_CONST = math.log(1.0 + math.exp(-1.0))


def _round_up(a, b):
    return ((a + b - 1) // b) * b


def _make_kernel(tm, lane, sub, grid_n, rem_rows, unroll):
    """Per-program partial-sum kernel over a (tm, lane) block.

    tm, rem_rows are multiples of `sub`; rem_rows is the number of *valid* rows
    in the last block (== tm when the grid is not ragged).  All chunk counts are
    static, so no masking is ever needed.
    """
    full_chunks = tm // sub
    rem_chunks = rem_rows // sub
    ragged = rem_rows != tm
    n_lane_chunks = lane // 128
    n_fold = sub // 8

    def tile_sum(x_ref, n_chunks):
        def body(r, acc):
            off = pl.multiple_of(r * sub, sub)
            xc = x_ref[pl.ds(off, sub), :].astype(jnp.float32)      # (sub, lane)
            a = jnp.abs(xc)
            b = jnp.abs(1.0 - xc)
            # -log(e^-a + e^-b) == min(a,b) - log(1 + e^-|a-b|)   (stable, 2 EUP ops)
            t = jnp.minimum(a, b) - jnp.log(1.0 + jnp.exp(-jnp.abs(a - b)))
            if n_fold == 1:
                t8 = t
            else:                                                    # bf16/int8 chunks
                t8 = t[0:8, :]
                for h in range(1, n_fold):
                    t8 = t8 + t[h * 8:(h + 1) * 8, :]
            return acc + t8

        acc0 = jnp.zeros((8, lane), jnp.float32)
        u = max(1, min(unroll, n_chunks))
        p = jax.lax.fori_loop(0, n_chunks, body, acc0, unroll=u)

        # Lane reduce: vreg-aligned 128-wide chunks, pure VPU adds.
        q = p[:, 0:128]
        for c in range(1, n_lane_chunks):
            q = q + p[:, c * 128:(c + 1) * 128]
        return q

    def kernel(x_ref, out_ref):
        if not ragged:
            out_ref[0] = tile_sum(x_ref, full_chunks)
        else:
            i = pl.program_id(0)
            last = grid_n - 1

            @pl.when(i != last)
            def _():
                out_ref[0] = tile_sum(x_ref, full_chunks)

            @pl.when(i == last)
            def _():
                # Partial last block: only sum the statically-known valid chunks;
                # Pallas' out-of-bounds rows are never read.
                out_ref[0] = tile_sum(x_ref, rem_chunks)

    return kernel


def surface_loss(x, *, tm=2048, lane=1024, unroll=4):
    """x: any shape (interpreted as (N*H*W, N_samples)); returns scalar mean loss."""
    total = int(x.size)
    itemsize = jnp.dtype(x.dtype).itemsize
    sub = {4: 8, 2: 16, 1: 32}.get(itemsize, 8)   # sublane chunk height per dtype
    tm = _round_up(tm, sub)

    flat = x.reshape(-1)
    rows = pl.cdiv(total, lane)
    rows_p = _round_up(rows, sub)                 # rows after (possible) zero pad
    padded_total = rows_p * lane
    n_zero_pad = padded_total - total
    if n_zero_pad:
        # Only needed when total isn't a multiple of sub*lane.  Padded zeros are
        # corrected analytically below (each contributes exactly -_CONST).
        flat = jnp.pad(flat, (0, n_zero_pad))
    x2d = flat.reshape(rows_p, lane)

    # Tile-row selection: big streaming tiles, but keep >=2 programs when the
    # input is large enough so both v7x TensorCores get work.
    if rows_p >= 2 * tm:
        tm_eff = tm
    elif rows_p > tm:
        tm_eff = _round_up(pl.cdiv(rows_p, 2), sub)          # ~2 blocks
    elif rows_p >= 512 and rows_p % (2 * sub) == 0:
        tm_eff = rows_p // 2                                  # 2 equal blocks
    else:
        tm_eff = rows_p                                       # single small block
    grid_n = pl.cdiv(rows_p, tm_eff)
    rem_rows = rows_p - (grid_n - 1) * tm_eff                 # valid rows in last block

    kernel = _make_kernel(tm_eff, lane, sub, grid_n, rem_rows, unroll)

    cost = pl.CostEstimate(
        flops=10 * padded_total,
        transcendentals=2 * padded_total,
        bytes_accessed=padded_total * itemsize + grid_n * 8 * 128 * 4,
    )

    partials = pl.pallas_call(
        kernel,
        out_shape=jax.ShapeDtypeStruct((grid_n, 8, 128), jnp.float32),
        grid_spec=pltpu.PrefetchScalarGridSpec(
            num_scalar_prefetch=0,
            grid=(grid_n,),
            in_specs=[pl.BlockSpec((tm_eff, lane), lambda i: (i, 0))],
            out_specs=pl.BlockSpec((1, 8, 128), lambda i: (i, 0, 0)),
        ),
        compiler_params=pltpu.CompilerParams(
            dimension_semantics=("parallel",),
            vmem_limit_bytes=40 * 1024 * 1024,
        ),
        cost_estimate=cost,
    )(x2d)

    # Tiny final reduce + analytic pad correction + hoisted constant.
    kernel_sum = jnp.sum(partials, dtype=jnp.float32)
    valid_sum = kernel_sum + jnp.float32(n_zero_pad * _CONST)
    return valid_sum / total + _CONST


def _reference(x):
    xf = x.astype(jnp.float32)
    loss = -jnp.log(jnp.exp(-jnp.abs(xf)) + jnp.exp(-jnp.abs(1.0 - xf))) + _CONST
    return loss.mean()


if __name__ == "__main__":
    key = jax.random.PRNGKey(0)

    # Primary check: x = (N*H*W, N_samples) with N=2, H=W=16, N_samples=8 -> (512, 8)
    N, H, W, N_samples = 2, 16, 16, 8
    x = jax.random.normal(key, (N * H * W, N_samples), dtype=jnp.float32)
    out = jax.block_until_ready(surface_loss(x))
    ref = _reference(x)
    assert jnp.allclose(out, ref, atol=1e-5, rtol=1e-4), ("small", out, ref)

    # Multi-block check: 2 grid programs, no padding, no masking.
    k2 = jax.random.PRNGKey(1)
    x2 = jax.random.normal(k2, (65536, 8), dtype=jnp.float32)
    out2 = jax.block_until_ready(surface_loss(x2))
    ref2 = _reference(x2)
    assert jnp.allclose(out2, ref2, atol=1e-5, rtol=1e-4), ("multi", out2, ref2)

    # Ragged check: exercises the analytic zero-pad correction path.
    k3 = jax.random.PRNGKey(2)
    x3 = jax.random.normal(k3, (500, 7), dtype=jnp.float32)
    out3 = jax.block_until_ready(surface_loss(x3))
    ref3 = _reference(x3)
    assert jnp.allclose(out3, ref3, atol=1e-5, rtol=1e-4), ("ragged", out3, ref3)

    print("KERNEL_OK")
</pallas_src>

<mosaic_0001>
module attributes {stable_mosaic.version = 11 : i64} {
  func.func @kernel(%arg0: i32, %arg1: memref<8x1024xf32, #tpu.memory_space<vmem>>, %arg2: memref<1x8x128xf32, #tpu.memory_space<vmem>>) attributes {dimension_semantics = [#tpu.dimension_semantics<parallel>], iteration_bounds = array<i64: 1>, scalar_prefetch = 0 : i64, scratch_operands = 0 : i64, tpu.core_type = #tpu.core_type<tc>, window_params = [{transform_indices = @transform_0, window_bounds = array<i64: 8, 1024>}, {transform_indices = @transform_1, window_bounds = array<i64: 1, 8, 128>}]} {
    %cst = arith.constant 0.000000e+00 : f32
    %0 = vector.broadcast %cst : f32 to vector<8x1024xf32>
    %c0_i32 = arith.constant 0 : i32
    %c8_i32 = arith.constant 8 : i32
    %1 = arith.muli %c0_i32, %c8_i32 : i32
    %2 = tpu.assume_multiple %1, 8 : i32
    %3 = arith.index_cast %2 : i32 to index
    %c0 = arith.constant 0 : index
    %4 = vector.load %arg1[%3, %c0] : memref<8x1024xf32, #tpu.memory_space<vmem>>, vector<8x1024xf32>
    %5 = math.absf %4 : vector<8x1024xf32>
    %cst_0 = arith.constant 1.000000e+00 : f32
    %6 = vector.broadcast %cst_0 : f32 to vector<8x1024xf32>
    %7 = arith.subf %6, %4 : vector<8x1024xf32>
    %8 = math.absf %7 : vector<8x1024xf32>
    %9 = arith.minimumf %5, %8 : vector<8x1024xf32>
    %10 = arith.subf %5, %8 : vector<8x1024xf32>
    %11 = math.absf %10 : vector<8x1024xf32>
    %cst_1 = arith.constant 0.000000e+00 : f32
    %12 = vector.broadcast %cst_1 : f32 to vector<8x1024xf32>
    %13 = arith.subf %12, %11 : vector<8x1024xf32>
    %14 = math.exp %13 : vector<8x1024xf32>
    %cst_2 = arith.constant 1.000000e+00 : f32
    %15 = vector.broadcast %cst_2 : f32 to vector<8x1024xf32>
    %16 = arith.addf %15, %14 : vector<8x1024xf32>
    %17 = math.log %16 : vector<8x1024xf32>
    %18 = arith.subf %9, %17 : vector<8x1024xf32>
    %19 = arith.addf %0, %18 : vector<8x1024xf32>
    %c1_i32 = arith.constant 1 : i32
    %20 = vector.extract_strided_slice %19 {offsets = [0, 0], sizes = [8, 128], strides = [1, 1]} : vector<8x1024xf32> to vector<8x128xf32>
    %21 = vector.extract_strided_slice %19 {offsets = [0, 128], sizes = [8, 128], strides = [1, 1]} : vector<8x1024xf32> to vector<8x128xf32>
    %22 = arith.addf %20, %21 : vector<8x128xf32>
    %23 = vector.extract_strided_slice %19 {offsets = [0, 256], sizes = [8, 128], strides = [1, 1]} : vector<8x1024xf32> to vector<8x128xf32>
    %24 = arith.addf %22, %23 : vector<8x128xf32>
    %25 = vector.extract_strided_slice %19 {offsets = [0, 384], sizes = [8, 128], strides = [1, 1]} : vector<8x1024xf32> to vector<8x128xf32>
    %26 = arith.addf %24, %25 : vector<8x128xf32>
    %27 = vector.extract_strided_slice %19 {offsets = [0, 512], sizes = [8, 128], strides = [1, 1]} : vector<8x1024xf32> to vector<8x128xf32>
    %28 = arith.addf %26, %27 : vector<8x128xf32>
    %29 = vector.extract_strided_slice %19 {offsets = [0, 640], sizes = [8, 128], strides = [1, 1]} : vector<8x1024xf32> to vector<8x128xf32>
    %30 = arith.addf %28, %29 : vector<8x128xf32>
    %31 = vector.extract_strided_slice %19 {offsets = [0, 768], sizes = [8, 128], strides = [1, 1]} : vector<8x1024xf32> to vector<8x128xf32>
    %32 = arith.addf %30, %31 : vector<8x128xf32>
    %33 = vector.extract_strided_slice %19 {offsets = [0, 896], sizes = [8, 128], strides = [1, 1]} : vector<8x1024xf32> to vector<8x128xf32>
    %34 = arith.addf %32, %33 : vector<8x128xf32>
    %c0_3 = arith.constant 0 : index
    %c0_4 = arith.constant 0 : index
    %c0_5 = arith.constant 0 : index
    %35 = vector.load %arg2[%c0_3, %c0_4, %c0_5] : memref<1x8x128xf32, #tpu.memory_space<vmem>>, vector<1x8x128xf32>
    %36 = vector.shape_cast %35 : vector<1x8x128xf32> to vector<8x128xf32>
    %37 = vector.shape_cast %34 : vector<8x128xf32> to vector<1x8x128xf32>
    tpu.vector_store %arg2[%c0_3, %c0_4, %c0_5], %37 {strides = array<i32>} : memref<1x8x128xf32, #tpu.memory_space<vmem>>, vector<1x8x128xf32>,
    return
  }
  func.func @transform_0(%arg0: i32) -> (i32, i32) {
    %c0_i32 = arith.constant 0 : i32
    %c0_i32_0 = arith.constant 0 : i32
    return %arg0, %c0_i32 : i32, i32
  }
  func.func @transform_1(%arg0: i32) -> (i32, i32, i32) {
    %c0_i32 = arith.constant 0 : i32
    %c0_i32_0 = arith.constant 0 : i32
    %c0_i32_1 = arith.constant 0 : i32
    return %arg0, %c0_i32, %c0_i32_0 : i32, i32, i32
  }
}

</mosaic_0001>

<bundles_post_ra>
// kernel: tpu_custom_call.1
= control target key start
LH: loop header
LB: loop body
LE: loop exit
PB: predicated region body
PF: predicated region fallthrough
CT: control target
= control target key end

     0   :  { %6 = vsyncpa [#allocation3], 0  ;;  %s359_s0 = inlined_call_operand.hbm [shape: f32[8,1024], index: 0, kind: input, shape index: {}]   ;;  %s360_s1 = inlined_call_operand.hbm [shape: f32[1,8,128], index: 1, kind: output, shape index: {}]  }
   0x1   :  { %7 = vsyncpa [#allocation4], 0  ;;  %s245_s6 = smov [#allocation2]  }
   0x2   :  { %s14_s7 = sshll.u32 %s245_s6, 4  ;;  %s15_s7 = int_to_ptr.vmem [resolvable:$true] %s14_s7 }
   0x3   :  { %s209_s8 = scalar_lea.vmem %s15_s7, 1024  ;;  %p214_p1 = scmp.lt.s32.totalorder %s15_s7, %s15_s7 }
   0x4   :  { %p210_p0 = scmp.ne.s32.totalorder %s15_s7, %s209_s8  ;;  %p215_p2 = scmp.lt.s32.totalorder %s209_s8, %s209_s8 }
   0x6   :  { %p216_p3 = por %p215_p2, %p214_p1 }
   0x8   :  { %p217_p4 = pnand %p216_p3, %p210_p0 }
   0xa   :  { %220 = shalt.err (!%p217_p4)
}
   0xb   :  { %17 = dma.hbm_to_vmem [thread:$0]  %s359_s0, 1024, %s15_s7, [#allocation3]  }
   0xc   :  { %241 = dma.done.wait [#allocation3], 1024  }
   0xd   :  { %242 = vsyncadd [#allocation3], 4294966272  ;;  %v260_v0 = vld [vmem:[#allocation2] sm:$0xff]  ;;  %v262_v1 = vld [vmem:[#allocation2 + $0x8] sm:$0xff]  ;;  %s246_s0 = smov [#allocation5]  }
   0xe   :  { %v264_v2 = vld [vmem:[#allocation2 + $0x10] sm:$0xff]  ;;  %v266_v3 = vld [vmem:[#allocation2 + $0x18] sm:$0xff]  ;;  %v268_v4 = vld [vmem:[#allocation2 + $0x20] sm:$0xff]  ;;  %v32_v6 = vand.u32 2147483647, %v260_v0  ;;  %v40_v7 = vsub.f32 1.0, %v260_v0 }
   0xf   :  { %v270_v5 = vld [vmem:[#allocation2 + $0x28] sm:$0xff]  ;;  %v274_v8 = vld [vmem:[#allocation2 + $0x30] sm:$0xff]  ;;  %v276_v9 = vld [vmem:[#allocation2 + $0x38] sm:$0xff]  ;;  %v33_v10 = vand.u32 2147483647, %v262_v1  ;;  %v41_v17 = vsub.f32 1.0, %v262_v1 }
  0x10   :  { %v34_v11 = vand.u32 2147483647, %v264_v2  ;;  %v35_v12 = vand.u32 2147483647, %v266_v3  ;;  %v36_v13 = vand.u32 2147483647, %v268_v4 }
  0x11   :  { %v37_v14 = vand.u32 2147483647, %v270_v5  ;;  %v38_v15 = vand.u32 2147483647, %v274_v8  ;;  %v39_v16 = vand.u32 2147483647, %v276_v9 }
  0x12   :  { %v42_v18 = vsub.f32 1.0, %v264_v2  ;;  %v43_v19 = vsub.f32 1.0, %v266_v3  ;;  %v44_v20 = vsub.f32 1.0, %v268_v4  ;;  %v45_v21 = vsub.f32 1.0, %v270_v5  ;;  %s158_s11 = sshll.u32 %s246_s0, 4  ;;  %s159_s11 = int_to_ptr.vmem [resolvable:$true] %s158_s11 }
  0x13   :  { %v46_v22 = vsub.f32 1.0, %v274_v8  ;;  %v47_v23 = vsub.f32 1.0, %v276_v9  ;;  %v292_v24 = vand.u32 2147483647, %v40_v7  ;;  %v294_v25 = vand.u32 2147483647, %v41_v17  ;;  %p226_p6 = scmp.lt.s32.totalorder %s159_s11, %s159_s11 }
  0x14   :  { %v296_v26 = vand.u32 2147483647, %v42_v18  ;;  %v298_v27 = vand.u32 2147483647, %v43_v19  ;;  %v300_v28 = vand.u32 2147483647, %v44_v20 }
  0x15   :  { %v302_v29 = vand.u32 2147483647, %v45_v21  ;;  %v304_v30 = vand.u32 2147483647, %v46_v22  ;;  %v306_v31 = vand.u32 2147483647, %v47_v23  ;;  %v64_v32 = vsub.f32 %v32_v6, %v292_v24 }
  0x16   :  { %v65_v33 = vsub.f32 %v33_v10, %v294_v25  ;;  %v66_v34 = vsub.f32 %v34_v11, %v296_v26  ;;  %v67_v35 = vsub.f32 %v35_v12, %v298_v27  ;;  %v68_v36 = vsub.f32 %v36_v13, %v300_v28  ;;  %s221_s12 = scalar_lea.vmem %s159_s11, 128 }
  0x17   :  { %v69_v37 = vsub.f32 %v37_v14, %v302_v29  ;;  %v70_v38 = vsub.f32 %v38_v15, %v304_v30  ;;  %v71_v39 = vsub.f32 %v39_v16, %v306_v31  ;;  %v72_v40 = vand.u32 2147483647, %v64_v32  ;;  %p222_p5 = scmp.ne.s32.totalorder %s159_s11, %s221_s12  ;;  %p227_p7 = scmp.lt.s32.totalorder %s221_s12, %s221_s12 }
  0x18   :  { %v73_v41 = vand.u32 2147483647, %v65_v33  ;;  %v74_v42 = vand.u32 2147483647, %v66_v34  ;;  %v75_v43 = vand.u32 2147483647, %v67_v35  ;;  %v60_v1 = vmin.f32 %v36_v13, %v300_v28 }
  0x19   :  { %v76_v44 = vand.u32 2147483647, %v68_v36  ;;  %v77_v45 = vand.u32 2147483647, %v69_v37  ;;  %v78_v46 = vand.u32 2147483647, %v70_v38  ;;  %v61_v3 = vmin.f32 %v37_v14, %v302_v29  ;;  %p228_p8 = por %p227_p7, %p226_p6 }
  0x1a   :  { %v79_v47 = vand.u32 2147483647, %v71_v39  ;;  %v80_v48 = vsub.f32 0.0, %v72_v40  ;;  %v81_v49 = vsub.f32 0.0, %v73_v41  ;;  %v82_v50 = vsub.f32 0.0, %v74_v42 }
  0x1b   :  { %v83_v51 = vsub.f32 0.0, %v75_v43  ;;  %v84_v52 = vsub.f32 0.0, %v76_v44  ;;  %v85_v53 = vsub.f32 0.0, %v77_v45  ;;  %v86_v54 = vsub.f32 0.0, %v78_v46  ;;  %p229_p9 = pnand %p228_p8, %p222_p5 }
  0x1c   :  { %v88_v55 = vmul.f32 1.442695, %v80_v48  ;;  %v90_v56 = vmul.f32 1.442695, %v81_v49  ;;  %v87_v57 = vsub.f32 0.0, %v79_v47  ;;  %v56_v40 = vmin.f32 %v32_v6, %v292_v24 }
  0x1d   :  { %v92_v58 = vmul.f32 1.442695, %v82_v50  ;;  %v94_v59 = vmul.f32 1.442695, %v83_v51  ;;  %v96_v60 = vmul.f32 1.442695, %v84_v52  ;;  %v57_v42 = vmin.f32 %v33_v10, %v294_v25 }
  0x1e   :  { %169 = vpow2.f32 %v88_v55  ;;  %v98_v61 = vmul.f32 1.442695, %v85_v53  ;;  %v100_v62 = vmul.f32 1.442695, %v86_v54  ;;  %v102_v63 = vmul.f32 1.442695, %v87_v57 }
  0x1f   :  { %171 = vpow2.f32 %v90_v56  ;;  %v58_v44 = vmin.f32 %v34_v11, %v296_v26  ;;  %v59_v47 = vmin.f32 %v35_v12, %v298_v27  ;;  %v62_v53 = vmin.f32 %v38_v15, %v304_v30 }
  0x20   :  { %173 = vpow2.f32 %v92_v58  ;;  %v63_v54 = vmin.f32 %v39_v16, %v306_v31 }
  0x21   :  { %175 = vpow2.f32 %v94_v59 }
  0x22   :  { %177 = vpow2.f32 %v96_v60 }
  0x23   :  { %179 = vpow2.f32 %v98_v61 }
  0x24   :  { %181 = vpow2.f32 %v100_v62 }
  0x25   :  { %183 = vpow2.f32 %v102_v63 }
  0x2b   :  { %v170_v7 = vpop.eup %169 }
  0x2c   :  { %v172_v17 = vpop.eup %171  ;;  %v104_v18 = vadd.f32 1.0, %v170_v7 }
  0x2d   :  { %v174_v19 = vpop.eup %173  ;;  %v105_v20 = vadd.f32 1.0, %v172_v17 }
  0x2e   :  { %v176_v21 = vpop.eup %175  ;;  %v106_v22 = vadd.f32 1.0, %v174_v19  ;;  %185 = vlog2.f32 %v104_v18 }
  0x2f   :  { %v178_v23 = vpop.eup %177  ;;  %v107_v32 = vadd.f32 1.0, %v176_v21  ;;  %187 = vlog2.f32 %v105_v20 }
  0x30   :  { %v180_v33 = vpop.eup %179  ;;  %v108_v34 = vadd.f32 1.0, %v178_v23  ;;  %189 = vlog2.f32 %v106_v22 }
  0x31   :  { %v182_v35 = vpop.eup %181  ;;  %v109_v36 = vadd.f32 1.0, %v180_v33  ;;  %191 = vlog2.f32 %v107_v32 }
  0x32   :  { %v184_v37 = vpop.eup %183  ;;  %v110_v38 = vadd.f32 1.0, %v182_v35  ;;  %193 = vlog2.f32 %v108_v34 }
  0x33   :  { %v111_v39 = vadd.f32 1.0, %v184_v37  ;;  %195 = vlog2.f32 %v109_v36 }
  0x34   :  { %197 = vlog2.f32 %v110_v38 }
  0x35   :  { %199 = vlog2.f32 %v111_v39 }
  0x3b   :  { %v186_v41 = vpop.eup %185 }
  0x3c   :  { %v188_v43 = vpop.eup %187  ;;  %v113_v45 = vmul.f32 0.6931472, %v186_v41 }
  0x3d   :  { %v190_v46 = vpop.eup %189  ;;  %v115_v48 = vmul.f32 0.6931472, %v188_v43 }
  0x3e   :  { %v192_v49 = vpop.eup %191  ;;  %v117_v0 = vmul.f32 0.6931472, %v190_v46  ;;  %v128_v6 = vsub.f32 %v56_v40, %v113_v45 }
  0x3f   :  { %v194_v24 = vpop.eup %193  ;;  %v119_v10 = vmul.f32 0.6931472, %v192_v49  ;;  %v129_v25 = vsub.f32 %v57_v42, %v115_v48 }
  0x40   :  { %v196_v50 = vpop.eup %195  ;;  %v121_v2 = vmul.f32 0.6931472, %v194_v24  ;;  %v130_v11 = vsub.f32 %v58_v44, %v117_v0 }
  0x41   :  { %v198_v26 = vpop.eup %197  ;;  %v123_v12 = vmul.f32 0.6931472, %v196_v50  ;;  %v131_v27 = vsub.f32 %v59_v47, %v119_v10  ;;  %v144_v51 = vadd.f32 %v129_v25, %v128_v6 }
  0x42   :  { %v200_v52 = vpop.eup %199  ;;  %v125_v4 = vmul.f32 0.6931472, %v198_v26  ;;  %v132_v13 = vsub.f32 %v60_v1, %v121_v2 }
  0x43   :  { %v145_v28 = vadd.f32 %v144_v51, %v130_v11  ;;  %v127_v55 = vmul.f32 0.6931472, %v200_v52  ;;  %v133_v56 = vsub.f32 %v61_v3, %v123_v12 }
  0x44   :  { %v134_v5 = vsub.f32 %v62_v53, %v125_v4 }
  0x45   :  { %v146_v57 = vadd.f32 %v145_v28, %v131_v27  ;;  %v135_v29 = vsub.f32 %v63_v54, %v127_v55 }
  0x47   :  { %v147_v14 = vadd.f32 %v146_v57, %v132_v13 }
  0x49   :  { %v148_v58 = vadd.f32 %v147_v14, %v133_v56 }
  0x4b   :  { %v149_v59 = vadd.f32 %v148_v58, %v134_v5 }
  0x4d   :  { %v150_v60 = vadd.f32 %v149_v59, %v135_v29 }
  0x4f   :  { %151 = vst [vmem:[#allocation5] sm:$0xff] %v150_v60 }
  0x50   :  { %232 = shalt.err (!%p229_p9)
}
  0x51   :  { %161 = dma.vmem_to_hbm [thread:$0]  %s159_s11, 128, %s360_s1, [#allocation4]  }
  0x52   :  { %243 = dma.done.wait [#allocation4], 128  }
  0x53   :  { %244 = vsyncadd [#allocation4], 4294967168 }
  0x54   :  { %165 = vsyncpa [#allocation3], 1 }
  0x55   :  { %166 = vsyncpa [#allocation4], 1 }

</bundles_post_ra>
